<compile_context>
chip_gen: v6e
topology: v6e:2x2x1
jax: 0.10.0
libtpu: 0.0.40
codegen_flags: <defaults>
</compile_context>

<pallas_src>
import numpy as np
import jax
import jax.numpy as jnp
from jax.experimental import pallas as pl
from jax.experimental.pallas import tpu as pltpu


# ----------------------------------------------------------------------------
# Parameter construction (plain JAX / numpy glue, done once, outside the kernel)
# ----------------------------------------------------------------------------

def _adaptive_pool_matrix(in_size, out_size):
    """Row-stochastic (out_size, in_size) matrix implementing 1-D adaptive avg pool
    with PyTorch's start/end index formula."""
    m = np.zeros((out_size, in_size), dtype=np.float32)
    for o in range(out_size):
        start = (o * in_size) // out_size
        end = -((-(o + 1) * in_size) // out_size)  # ceil((o+1)*in/out)
        m[o, start:end] = 1.0 / (end - start)
    return m


def make_params(C, L, H, W, reduction=4, eps=1e-5, seed=0):
    Cr = max(C // reduction, 1)
    k1, k2 = jax.random.split(jax.random.PRNGKey(seed))
    # Conv2d(.., kernel_size=1, bias=False) weights -> plain (out, in) matrices.
    w1 = jax.random.normal(k1, (Cr, C), jnp.float32) * 0.1
    w2 = jax.random.normal(k2, (C, Cr), jnp.float32) * 0.1

    # TODO(synk): BatchNorm2d modeled in eval mode (running stats); training-mode
    # batch statistics are not representable with folded weights.
    g1, be1, mu1, v1 = jnp.ones((Cr,)), jnp.zeros((Cr,)), jnp.zeros((Cr,)), jnp.ones((Cr,))
    g2, be2, mu2, v2 = jnp.ones((C,)),  jnp.zeros((C,)),  jnp.zeros((C,)),  jnp.ones((C,))
    s1 = g1 / jnp.sqrt(v1 + eps); b1 = be1 - mu1 * s1
    s2 = g2 / jnp.sqrt(v2 + eps); b2 = be2 - mu2 * s2
    a1 = jnp.full((Cr,), 0.25, jnp.float32)   # PReLU default init
    a2 = jnp.full((C,), 0.25, jnp.float32)

    # Fold BN scales into the 1x1-conv weights (exact in eval mode).
    w1f = (w1 * s1[:, None]).astype(jnp.float32)
    w2f = (w2 * s2[:, None]).astype(jnp.float32)
    p1 = jnp.stack([b1, a1], axis=1).astype(jnp.float32)   # (Cr, 2): [bias | alpha]
    p2 = jnp.stack([b2, a2], axis=1).astype(jnp.float32)   # (C, 2)

    # Separable adaptive-pool matrices, combined via Kronecker product.
    dh = _adaptive_pool_matrix(H, L); dw = _adaptive_pool_matrix(W, L)   # (L,H), (L,W)
    uh = _adaptive_pool_matrix(L, H); uw = _adaptive_pool_matrix(L, W)   # (H,L), (W,L)
    pdt = jnp.asarray(np.kron(dh, dw).T)                                 # (H*W, L*L)
    put = jnp.asarray(np.kron(uh, uw).T)                                 # (L*L, H*W)

    return pdt, put, w1f, p1, w2f, p2


# ----------------------------------------------------------------------------
# Kernels
# ----------------------------------------------------------------------------

def _attention_from_pooled(pooled, w1, b1, a1, w2, b2, a2):
    """pooled: (C, L*L) f32 for one batch -> channel-softmax attention (C, L*L)."""
    z1 = jnp.dot(w1, pooled, preferred_element_type=jnp.float32) + b1     # (Cr, LL)
    z1 = jnp.where(z1 >= 0, z1, a1 * z1)                                  # PReLU1
    z2 = jnp.dot(w2, z1, preferred_element_type=jnp.float32) + b2         # (C, LL)
    z2 = jnp.where(z2 >= 0, z2, a2 * z2)                                  # PReLU2
    e = jnp.exp(z2 - jnp.max(z2, axis=0, keepdims=True))                  # softmax(ch)
    return e / jnp.sum(e, axis=0, keepdims=True)


def local_se_fused_kernel(x_ref, pdt_ref, put_ref, w1_ref, p1_ref, w2_ref, p2_ref, o_ref):
    """Single-shot path: whole (BT, C, H*W) slab resident, one grid axis over batch."""
    BT, C, HW = x_ref.shape
    w1 = w1_ref[...].astype(jnp.float32)
    w2 = w2_ref[...].astype(jnp.float32)
    b1, a1 = p1_ref[:, 0:1].astype(jnp.float32), p1_ref[:, 1:2].astype(jnp.float32)
    b2, a2 = p2_ref[:, 0:1].astype(jnp.float32), p2_ref[:, 1:2].astype(jnp.float32)

    x2d = (x_ref[0] if BT == 1 else x_ref[...].reshape(BT * C, HW)).astype(jnp.float32)

    # Pool first (reverted reassociation), batch-fused: M = BT*C rows into the MXU.
    pooled = jnp.dot(x2d, pdt_ref[...].astype(jnp.float32),
                     preferred_element_type=jnp.float32)                  # (BT*C, LL)

    if BT == 1:
        att2d = _attention_from_pooled(pooled, w1, b1, a1, w2, b2, a2)
    else:
        LL = pooled.shape[1]
        p3 = pooled.reshape(BT, C, LL)
        att2d = jnp.concatenate(
            [_attention_from_pooled(p3[b], w1, b1, a1, w2, b2, a2) for b in range(BT)],
            axis=0)                                                       # (BT*C, LL)

    # Adaptive upsample back to H*W (batch-fused) and gate; lane-dense store.
    up = jnp.dot(att2d, put_ref[...].astype(jnp.float32),
                 preferred_element_type=jnp.float32)                      # (BT*C, HW)
    gated = x2d * up
    if BT == 1:
        o_ref[0] = gated.astype(o_ref.dtype)
    else:
        o_ref[...] = gated.reshape(BT, C, HW).astype(o_ref.dtype)


def local_se_att_kernel(x_ref, pdt_ref, w1_ref, p1_ref, w2_ref, p2_ref, att_ref, pool_acc):
    """HW-tiled phase 1: accumulate pooled (BT*C, L*L) over the H*W reduction axis,
    finalize the channel-softmax attention at the last tile."""
    k = pl.program_id(1)
    BT, C, THW = x_ref.shape

    @pl.when(k == 0)
    def _():
        pool_acc[...] = jnp.zeros_like(pool_acc)

    x2d = (x_ref[0] if BT == 1 else x_ref[...].reshape(BT * C, THW)).astype(jnp.float32)
    pool_acc[...] += jnp.dot(x2d, pdt_ref[...].astype(jnp.float32),
                             preferred_element_type=jnp.float32)          # (BT*C, LL)

    @pl.when(k == pl.num_programs(1) - 1)
    def _():
        w1 = w1_ref[...].astype(jnp.float32)
        w2 = w2_ref[...].astype(jnp.float32)
        b1, a1 = p1_ref[:, 0:1].astype(jnp.float32), p1_ref[:, 1:2].astype(jnp.float32)
        b2, a2 = p2_ref[:, 0:1].astype(jnp.float32), p2_ref[:, 1:2].astype(jnp.float32)
        pooled = pool_acc[...]
        if BT == 1:
            att_ref[0] = _attention_from_pooled(pooled, w1, b1, a1, w2, b2, a2)
        else:
            LL = pooled.shape[1]
            p3 = pooled.reshape(BT, C, LL)
            att_ref[...] = jnp.stack(
                [_attention_from_pooled(p3[b], w1, b1, a1, w2, b2, a2) for b in range(BT)],
                axis=0)


def local_se_gate_kernel(att_ref, x_ref, put_ref, o_ref):
    """HW-tiled phase 2: up-pool the attention for this lane-dense H*W tile and gate."""
    BT, C, THW = x_ref.shape
    att2d = (att_ref[0] if BT == 1 else
             att_ref[...].reshape(BT * C, att_ref.shape[-1])).astype(jnp.float32)
    x2d = (x_ref[0] if BT == 1 else x_ref[...].reshape(BT * C, THW)).astype(jnp.float32)
    up = jnp.dot(att2d, put_ref[...].astype(jnp.float32),
                 preferred_element_type=jnp.float32)                      # (BT*C, THW)
    gated = x2d * up
    if BT == 1:
        o_ref[0] = gated.astype(o_ref.dtype)
    else:
        o_ref[...] = gated.reshape(BT, C, THW).astype(o_ref.dtype)


# ----------------------------------------------------------------------------
# Wrapper: generation-aware sizing + path selection
# ----------------------------------------------------------------------------

def _vmem_capacity_bytes():
    try:
        return int(pltpu.get_tpu_info().vmem_capacity_bytes)
    except Exception:
        return 64 << 20   # conservative: v7x per-TensorCore VMEM


def _choose_bt(B, C, lanes, itemsize, max_block_bytes):
    """Batches per grid step: as big as the block budget allows while keeping
    >= 2 grid steps (both megacore TCs busy) whenever B >= 2."""
    if B <= 1:
        return 1
    best = 1
    for bt in range(1, B // 2 + 1):
        if B % bt == 0 and bt * C * lanes * itemsize <= max_block_bytes:
            best = bt
    return best


def _pick_hw_tile(HW, C, itemsize, block_target):
    """Largest multiple-of-128 divisor of H*W whose per-batch tile fits the block budget."""
    divs = [d for d in range(128, HW, 128) if HW % d == 0]
    if not divs:
        return None
    fitting = [d for d in divs if C * d * itemsize <= block_target]
    return max(fitting) if fitting else min(divs)


def _const_spec(shape, single):
    idx = lambda *_: (0,) * len(shape)
    if single:
        # Constant index_map -> a single VMEM buffer is enough; frees VMEM for x blocks.
        return pl.BlockSpec(shape, idx, pipeline_mode=pl.Buffered(1))
    return pl.BlockSpec(shape, idx)


def _local_se_fused(x_flat, params, bt, vmem_limit):
    pdt, put, w1f, p1, w2f, p2 = params
    B, C, HW = x_flat.shape
    LL = pdt.shape[1]
    Cr = w1f.shape[0]

    def run(single_buffer_consts):
        cs = lambda shape: _const_spec(shape, single_buffer_consts)
        return pl.pallas_call(
            local_se_fused_kernel,
            out_shape=jax.ShapeDtypeStruct((B, C, HW), x_flat.dtype),
            grid=(B // bt,),
            in_specs=[
                pl.BlockSpec((bt, C, HW), lambda i: (i, 0, 0)),   # x (batch-chunked)
                cs((HW, LL)),                                     # P_down^T
                cs((LL, HW)),                                     # P_up^T
                cs((Cr, C)),                                      # conv1 w (bn1 folded)
                cs((Cr, 2)),                                      # [bn1 shift | prelu1 a]
                cs((C, Cr)),                                      # conv2 w (bn2 folded)
                cs((C, 2)),                                       # [bn2 shift | prelu2 a]
            ],
            out_specs=pl.BlockSpec((bt, C, HW), lambda i: (i, 0, 0)),
            compiler_params=pltpu.CompilerParams(
                dimension_semantics=("parallel",),
                vmem_limit_bytes=vmem_limit),
        )(x_flat, pdt, put, w1f, p1, w2f, p2)

    try:
        return run(True)
    except Exception:
        return run(False)   # pipeline_mode / Buffered(1) unsupported -> default buffering


def _local_se_tiled(x_flat, params, bt, hw_tile, att_vmem, gate_vmem):
    pdt, put, w1f, p1, w2f, p2 = params
    B, C, HW = x_flat.shape
    LL = pdt.shape[1]
    Cr = w1f.shape[0]
    n_hw = HW // hw_tile

    def run(single_buffer_consts):
        cs = lambda shape: _const_spec(shape, single_buffer_consts)
        # Phase 1: accumulate pooled over lane-dense H*W tiles, finalize attention.
        att = pl.pallas_call(
            local_se_att_kernel,
            out_shape=jax.ShapeDtypeStruct((B, C, LL), jnp.float32),
            grid=(B // bt, n_hw),
            in_specs=[
                pl.BlockSpec((bt, C, hw_tile), lambda b, k: (b, 0, k)),
                pl.BlockSpec((hw_tile, LL), lambda b, k: (k, 0)),
                cs((Cr, C)),
                cs((Cr, 2)),
                cs((C, Cr)),
                cs((C, 2)),
            ],
            out_specs=pl.BlockSpec((bt, C, LL), lambda b, k: (b, 0, 0)),
            scratch_shapes=[pltpu.VMEM((bt * C, LL), jnp.float32)],
            compiler_params=pltpu.CompilerParams(
                dimension_semantics=("parallel", "arbitrary"),
                vmem_limit_bytes=att_vmem),
        )(x_flat, pdt, w1f, p1, w2f, p2)

        # Phase 2: re-stream x tiles, up-pool + gate per lane-dense tile.
        return pl.pallas_call(
            local_se_gate_kernel,
            out_shape=jax.ShapeDtypeStruct((B, C, HW), x_flat.dtype),
            grid=(B // bt, n_hw),
            in_specs=[
                pl.BlockSpec((bt, C, LL), lambda b, k: (b, 0, 0)),
                pl.BlockSpec((bt, C, hw_tile), lambda b, k: (b, 0, k)),
                pl.BlockSpec((LL, hw_tile), lambda b, k: (0, k)),
            ],
            out_specs=pl.BlockSpec((bt, C, hw_tile), lambda b, k: (b, 0, k)),
            compiler_params=pltpu.CompilerParams(
                dimension_semantics=("parallel", "arbitrary"),
                vmem_limit_bytes=gate_vmem),
        )(att, x_flat, put)

    try:
        return run(True)
    except Exception:
        return run(False)


def local_se_pallas(x, params, *, force_hw_tile=None):
    B, C, H, W = x.shape
    pdt, put, w1f, p1, w2f, p2 = params
    HW = H * W
    LL = pdt.shape[1]
    Cr = w1f.shape[0]
    itemsize = jnp.dtype(x.dtype).itemsize
    x_flat = x.reshape(B, C, HW)

    vmem_cap = _vmem_capacity_bytes()
    vmem_budget = int(vmem_cap * 0.55)
    # Generation-aware block target: big blocks on 128-MiB parts, modest on v7x.
    block_target = (12 << 20) if vmem_cap >= (96 << 20) else (4 << 20)
    const_bytes = (2 * HW * LL + 2 * Cr * C + 2 * Cr + 2 * C) * 4
    margin = 2 << 20

    def clamp(need):
        return int(min(max(need, 16 << 20), int(vmem_cap * 0.65)))

    def fused_need(bt):
        blk = bt * C * HW * itemsize
        tmp = 2 * bt * C * HW * 4 + 2 * bt * C * LL * 4   # f32 x2d/up temporaries
        return 4 * blk + 2 * const_bytes + tmp + margin

    hw_tile = force_hw_tile
    if hw_tile is None:
        bt = _choose_bt(B, C, HW, itemsize, block_target)
        if fused_need(bt) > vmem_budget:
            bt = 1
        if fused_need(bt) <= vmem_budget:
            return _local_se_fused(x_flat, params, bt,
                                   clamp(fused_need(bt))).reshape(B, C, H, W)
        hw_tile = _pick_hw_tile(HW, C, itemsize, block_target)
        if hw_tile is None:
            # TODO(synk): H*W has no multiple-of-128 divisor; fall back to the
            # single-shot path with a raised VMEM limit instead of padding tiles.
            return _local_se_fused(x_flat, params, 1,
                                   clamp(fused_need(1))).reshape(B, C, H, W)
    else:
        if HW % hw_tile != 0 or not (hw_tile % 128 == 0 or hw_tile == HW):
            raise ValueError("force_hw_tile must divide H*W and be a multiple of 128")

    bt = _choose_bt(B, C, hw_tile, itemsize, block_target)
    att_need = (2 * bt * C * hw_tile * itemsize + 2 * hw_tile * LL * 4 + 2 * const_bytes
                + 3 * bt * C * LL * 4 + bt * C * hw_tile * 4 + margin)
    gate_need = (4 * bt * C * hw_tile * itemsize + 2 * LL * hw_tile * 4
                 + 2 * bt * C * LL * 4 + bt * C * hw_tile * 4 + margin)
    return _local_se_tiled(x_flat, params, bt, hw_tile,
                           clamp(att_need), clamp(gate_need)).reshape(B, C, H, W)


# ----------------------------------------------------------------------------
# Pure-JAX reference (identical semantics, exact softmax)
# ----------------------------------------------------------------------------

def local_se_reference(x, params):
    pdt, put, w1f, p1, w2f, p2 = params
    B, C, H, W = x.shape
    xf = x.reshape(B, C, H * W).astype(jnp.float32)
    b1, a1 = p1[:, 0][None, :, None], p1[:, 1][None, :, None]
    b2, a2 = p2[:, 0][None, :, None], p2[:, 1][None, :, None]
    pooled = jnp.einsum('bcs,st->bct', xf, pdt)
    z1 = jnp.einsum('rc,bct->brt', w1f, pooled) + b1
    z1 = jnp.where(z1 >= 0, z1, a1 * z1)
    z2 = jnp.einsum('cr,brt->bct', w2f, z1) + b2
    z2 = jnp.where(z2 >= 0, z2, a2 * z2)
    att = jax.nn.softmax(z2, axis=1)
    up = jnp.einsum('bct,ts->bcs', att, put)
    return (xf * up).reshape(B, C, H, W).astype(x.dtype)


if __name__ == "__main__":
    B, C, H, W = 2, 8, 16, 16
    L, reduction = 3, 4

    x = jax.random.uniform(jax.random.PRNGKey(0), (B, C, H, W), dtype=jnp.float32)
    params = make_params(C, L, H, W, reduction=reduction, seed=0)

    ref = local_se_reference(x, params)

    # Default path (single fused kernel, batch-chunked grid).
    out = jax.block_until_ready(local_se_pallas(x, params))
    assert out.shape == (B, C, H, W)
    # Tolerance 1e-2: default MXU matmul precision (no "highest") in the kernel.
    np.testing.assert_allclose(np.asarray(out), np.asarray(ref), rtol=1e-2, atol=1e-2)

    # HW-tiled two-phase path (chosen automatically when the per-batch C*H*W slab
    # exceeds the generation-aware VMEM budget, e.g. large activations on v7x's
    # 64 MiB VMEM); force it here to verify it runs and matches.
    out_tiled = jax.block_until_ready(local_se_pallas(x, params, force_hw_tile=128))
    np.testing.assert_allclose(np.asarray(out_tiled), np.asarray(ref), rtol=1e-2, atol=1e-2)

    print("KERNEL_OK")
</pallas_src>

<mosaic_0001>
module attributes {stable_mosaic.version = 11 : i64} {
  func.func @local_se_fused_kernel(%arg0: i32, %arg1: memref<1x8x256xf32, #tpu.memory_space<vmem>>, %arg2: memref<256x9xf32, #tpu.memory_space<vmem>>, %arg3: memref<9x256xf32, #tpu.memory_space<vmem>>, %arg4: memref<2x8xf32, #tpu.memory_space<vmem>>, %arg5: memref<2x2xf32, #tpu.memory_space<vmem>>, %arg6: memref<8x2xf32, #tpu.memory_space<vmem>>, %arg7: memref<8x2xf32, #tpu.memory_space<vmem>>, %arg8: memref<1x8x256xf32, #tpu.memory_space<vmem>>) attributes {dimension_semantics = [#tpu.dimension_semantics<parallel>], iteration_bounds = array<i64: 2>, scalar_prefetch = 0 : i64, scratch_operands = 0 : i64, tpu.core_type = #tpu.core_type<tc>, window_params = [{transform_indices = @transform_0, window_bounds = array<i64: 1, 8, 256>}, {pipeline_mode = #tpu.pipeline_mode<synchronous>, transform_indices = @transform_1, window_bounds = array<i64: 256, 9>}, {pipeline_mode = #tpu.pipeline_mode<synchronous>, transform_indices = @transform_2, window_bounds = array<i64: 9, 256>}, {pipeline_mode = #tpu.pipeline_mode<synchronous>, transform_indices = @transform_3, window_bounds = array<i64: 2, 8>}, {pipeline_mode = #tpu.pipeline_mode<synchronous>, transform_indices = @transform_4, window_bounds = array<i64: 2, 2>}, {pipeline_mode = #tpu.pipeline_mode<synchronous>, transform_indices = @transform_5, window_bounds = array<i64: 8, 2>}, {pipeline_mode = #tpu.pipeline_mode<synchronous>, transform_indices = @transform_6, window_bounds = array<i64: 8, 2>}, {transform_indices = @transform_7, window_bounds = array<i64: 1, 8, 256>}]} {
    %c0 = arith.constant 0 : index
    %c0_0 = arith.constant 0 : index
    %0 = vector.load %arg4[%c0, %c0_0] : memref<2x8xf32, #tpu.memory_space<vmem>>, vector<2x8xf32>
    %c0_1 = arith.constant 0 : index
    %c0_2 = arith.constant 0 : index
    %1 = vector.load %arg6[%c0_1, %c0_2] : memref<8x2xf32, #tpu.memory_space<vmem>>, vector<8x2xf32>
    %c0_3 = arith.constant 0 : index
    %c0_4 = arith.constant 0 : index
    %2 = vector.load %arg5[%c0_3, %c0_4] : memref<2x2xf32, #tpu.memory_space<vmem>>, vector<2x1xf32>
    %c0_5 = arith.constant 0 : index
    %c1 = arith.constant 1 : index
    %3 = vector.load %arg5[%c0_5, %c1] : memref<2x2xf32, #tpu.memory_space<vmem>>, vector<2x1xf32>
    %c0_6 = arith.constant 0 : index
    %c0_7 = arith.constant 0 : index
    %4 = vector.load %arg7[%c0_6, %c0_7] : memref<8x2xf32, #tpu.memory_space<vmem>>, vector<8x1xf32>
    %c0_8 = arith.constant 0 : index
    %c1_9 = arith.constant 1 : index
    %5 = vector.load %arg7[%c0_8, %c1_9] : memref<8x2xf32, #tpu.memory_space<vmem>>, vector<8x1xf32>
    %c0_10 = arith.constant 0 : index
    %c0_11 = arith.constant 0 : index
    %c0_12 = arith.constant 0 : index
    %6 = vector.load %arg1[%c0_10, %c0_11, %c0_12] : memref<1x8x256xf32, #tpu.memory_space<vmem>>, vector<1x8x256xf32>
    %7 = vector.shape_cast %6 : vector<1x8x256xf32> to vector<8x256xf32>
    %c0_13 = arith.constant 0 : index
    %c0_14 = arith.constant 0 : index
    %8 = vector.load %arg2[%c0_13, %c0_14] : memref<256x9xf32, #tpu.memory_space<vmem>>, vector<256x9xf32>
    %cst = arith.constant dense<0.000000e+00> : vector<8x9xf32>
    %9 = tpu.matmul %7, %8, %cst {dimension_numbers = #tpu.dot_dimension_numbers<[1], [0], [0], [1], [0, 0, 1, 1], [], []>} : vector<8x256xf32>, vector<256x9xf32>, vector<8x9xf32> -> vector<8x9xf32>
    %cst_15 = arith.constant dense<0.000000e+00> : vector<2x9xf32>
    %10 = tpu.matmul %0, %9, %cst_15 {dimension_numbers = #tpu.dot_dimension_numbers<[1], [0], [0], [1], [0, 0, 1, 1], [], []>} : vector<2x8xf32>, vector<8x9xf32>, vector<2x9xf32> -> vector<2x9xf32>
    %11 = vector.broadcast %2 : vector<2x1xf32> to vector<2x9xf32>
    %12 = arith.addf %10, %11 : vector<2x9xf32>
    %cst_16 = arith.constant 0.000000e+00 : f32
    %13 = vector.broadcast %cst_16 : f32 to vector<2x9xf32>
    %14 = arith.cmpf oge, %12, %13 : vector<2x9xf32>
    %15 = vector.broadcast %3 : vector<2x1xf32> to vector<2x9xf32>
    %16 = arith.mulf %15, %12 : vector<2x9xf32>
    %17 = arith.select %14, %12, %16 : vector<2x9xi1>, vector<2x9xf32>
    %cst_17 = arith.constant dense<0.000000e+00> : vector<8x9xf32>
    %18 = tpu.matmul %1, %17, %cst_17 {dimension_numbers = #tpu.dot_dimension_numbers<[1], [0], [0], [1], [0, 0, 1, 1], [], []>} : vector<8x2xf32>, vector<2x9xf32>, vector<8x9xf32> -> vector<8x9xf32>
    %19 = vector.broadcast %4 : vector<8x1xf32> to vector<8x9xf32>
    %20 = arith.addf %18, %19 : vector<8x9xf32>
    %cst_18 = arith.constant 0.000000e+00 : f32
    %21 = vector.broadcast %cst_18 : f32 to vector<8x9xf32>
    %22 = arith.cmpf oge, %20, %21 : vector<8x9xf32>
    %23 = vector.broadcast %5 : vector<8x1xf32> to vector<8x9xf32>
    %24 = arith.mulf %23, %20 : vector<8x9xf32>
    %25 = arith.select %22, %20, %24 : vector<8x9xi1>, vector<8x9xf32>
    %cst_19 = arith.constant dense<0xFF800000> : vector<9xf32>
    %26 = vector.multi_reduction <maximumf>, %25, %cst_19 [0] : vector<8x9xf32> to vector<9xf32>
    %27 = vector.shape_cast %26 : vector<9xf32> to vector<1x9xf32>
    %28 = vector.broadcast %27 : vector<1x9xf32> to vector<8x9xf32>
    %29 = arith.subf %25, %28 : vector<8x9xf32>
    %30 = math.exp %29 : vector<8x9xf32>
    %cst_20 = arith.constant dense<0.000000e+00> : vector<9xf32>
    %31 = vector.multi_reduction <add>, %30, %cst_20 [0] : vector<8x9xf32> to vector<9xf32>
    %32 = vector.shape_cast %31 : vector<9xf32> to vector<1x9xf32>
    %33 = vector.broadcast %32 : vector<1x9xf32> to vector<8x9xf32>
    %34 = arith.divf %30, %33 : vector<8x9xf32>
    %c0_21 = arith.constant 0 : index
    %c0_22 = arith.constant 0 : index
    %35 = vector.load %arg3[%c0_21, %c0_22] : memref<9x256xf32, #tpu.memory_space<vmem>>, vector<9x256xf32>
    %cst_23 = arith.constant dense<0.000000e+00> : vector<8x256xf32>
    %36 = tpu.matmul %34, %35, %cst_23 {dimension_numbers = #tpu.dot_dimension_numbers<[1], [0], [0], [1], [0, 0, 1, 1], [], []>} : vector<8x9xf32>, vector<9x256xf32>, vector<8x256xf32> -> vector<8x256xf32>
    %37 = arith.mulf %7, %36 : vector<8x256xf32>
    %c0_24 = arith.constant 0 : index
    %c0_25 = arith.constant 0 : index
    %c0_26 = arith.constant 0 : index
    %38 = vector.load %arg8[%c0_24, %c0_25, %c0_26] : memref<1x8x256xf32, #tpu.memory_space<vmem>>, vector<1x8x256xf32>
    %39 = vector.shape_cast %38 : vector<1x8x256xf32> to vector<8x256xf32>
    %40 = vector.shape_cast %37 : vector<8x256xf32> to vector<1x8x256xf32>
    tpu.vector_store %arg8[%c0_24, %c0_25, %c0_26], %40 {strides = array<i32>} : memref<1x8x256xf32, #tpu.memory_space<vmem>>, vector<1x8x256xf32>,
    return
  }
  func.func @transform_0(%arg0: i32) -> (i32, i32, i32) {
    %c0_i32 = arith.constant 0 : i32
    %c0_i32_0 = arith.constant 0 : i32
    %c0_i32_1 = arith.constant 0 : i32
    return %arg0, %c0_i32, %c0_i32_0 : i32, i32, i32
  }
  func.func @transform_1(%arg0: i32) -> (i32, i32) {
    %c0_i32 = arith.constant 0 : i32
    %c0_i32_0 = arith.constant 0 : i32
    %c0_i32_1 = arith.constant 0 : i32
    return %c0_i32, %c0_i32_0 : i32, i32
  }
  func.func @transform_2(%arg0: i32) -> (i32, i32) {
    %c0_i32 = arith.constant 0 : i32
    %c0_i32_0 = arith.constant 0 : i32
    %c0_i32_1 = arith.constant 0 : i32
    return %c0_i32, %c0_i32_0 : i32, i32
  }
  func.func @transform_3(%arg0: i32) -> (i32, i32) {
    %c0_i32 = arith.constant 0 : i32
    %c0_i32_0 = arith.constant 0 : i32
    %c0_i32_1 = arith.constant 0 : i32
    return %c0_i32, %c0_i32_0 : i32, i32
  }
  func.func @transform_4(%arg0: i32) -> (i32, i32) {
    %c0_i32 = arith.constant 0 : i32
    %c0_i32_0 = arith.constant 0 : i32
    %c0_i32_1 = arith.constant 0 : i32
    return %c0_i32, %c0_i32_0 : i32, i32
  }
  func.func @transform_5(%arg0: i32) -> (i32, i32) {
    %c0_i32 = arith.constant 0 : i32
    %c0_i32_0 = arith.constant 0 : i32
    %c0_i32_1 = arith.constant 0 : i32
    return %c0_i32, %c0_i32_0 : i32, i32
  }
  func.func @transform_6(%arg0: i32) -> (i32, i32) {
    %c0_i32 = arith.constant 0 : i32
    %c0_i32_0 = arith.constant 0 : i32
    %c0_i32_1 = arith.constant 0 : i32
    return %c0_i32, %c0_i32_0 : i32, i32
  }
  func.func @transform_7(%arg0: i32) -> (i32, i32, i32) {
    %c0_i32 = arith.constant 0 : i32
    %c0_i32_0 = arith.constant 0 : i32
    %c0_i32_1 = arith.constant 0 : i32
    return %arg0, %c0_i32, %c0_i32_0 : i32, i32, i32
  }
}

module attributes {stable_mosaic.version = 11 : i64} {
  func.func @local_se_fused_kernel(%arg0: i32, %arg1: memref<1x8x256xf32, #tpu.memory_space<vmem>>, %arg2: memref<256x9xf32, #tpu.memory_space<vmem>>, %arg3: memref<9x256xf32, #tpu.memory_space<vmem>>, %arg4: memref<2x8xf32, #tpu.memory_space<vmem>>, %arg5: memref<2x2xf32, #tpu.memory_space<vmem>>, %arg6: memref<8x2xf32, #tpu.memory_space<vmem>>, %arg7: memref<8x2xf32, #tpu.memory_space<vmem>>, %arg8: memref<1x8x256xf32, #tpu.memory_space<vmem>>) attributes {dimension_semantics = [#tpu.dimension_semantics<parallel>], iteration_bounds = array<i64: 2>, scalar_prefetch = 0 : i64, scratch_operands = 0 : i64, tpu.core_type = #tpu.core_type<tc>, window_params = [{transform_indices = @transform_0, window_bounds = array<i64: 1, 8, 256>}, {pipeline_mode = #tpu.pipeline_mode<synchronous>, transform_indices = @transform_1, window_bounds = array<i64: 256, 9>}, {pipeline_mode = #tpu.pipeline_mode<synchronous>, transform_indices = @transform_2, window_bounds = array<i64: 9, 256>}, {pipeline_mode = #tpu.pipeline_mode<synchronous>, transform_indices = @transform_3, window_bounds = array<i64: 2, 8>}, {pipeline_mode = #tpu.pipeline_mode<synchronous>, transform_indices = @transform_4, window_bounds = array<i64: 2, 2>}, {pipeline_mode = #tpu.pipeline_mode<synchronous>, transform_indices = @transform_5, window_bounds = array<i64: 8, 2>}, {pipeline_mode = #tpu.pipeline_mode<synchronous>, transform_indices = @transform_6, window_bounds = array<i64: 8, 2>}, {transform_indices = @transform_7, window_bounds = array<i64: 1, 8, 256>}]} {
    %c0 = arith.constant 0 : index
    %c0_0 = arith.constant 0 : index
    %0 = vector.load %arg4[%c0, %c0_0] : memref<2x8xf32, #tpu.memory_space<vmem>>, vector<2x8xf32>
    %c0_1 = arith.constant 0 : index
    %c0_2 = arith.constant 0 : index
    %1 = vector.load %arg6[%c0_1, %c0_2] : memref<8x2xf32, #tpu.memory_space<vmem>>, vector<8x2xf32>
    %c0_3 = arith.constant 0 : index
    %c0_4 = arith.constant 0 : index
    %2 = vector.load %arg5[%c0_3, %c0_4] : memref<2x2xf32, #tpu.memory_space<vmem>>, vector<2x1xf32>
    %c0_5 = arith.constant 0 : index
    %c1 = arith.constant 1 : index
    %3 = vector.load %arg5[%c0_5, %c1] : memref<2x2xf32, #tpu.memory_space<vmem>>, vector<2x1xf32>
    %c0_6 = arith.constant 0 : index
    %c0_7 = arith.constant 0 : index
    %4 = vector.load %arg7[%c0_6, %c0_7] : memref<8x2xf32, #tpu.memory_space<vmem>>, vector<8x1xf32>
    %c0_8 = arith.constant 0 : index
    %c1_9 = arith.constant 1 : index
    %5 = vector.load %arg7[%c0_8, %c1_9] : memref<8x2xf32, #tpu.memory_space<vmem>>, vector<8x1xf32>
    %c0_10 = arith.constant 0 : index
    %c0_11 = arith.constant 0 : index
    %c0_12 = arith.constant 0 : index
    %6 = vector.load %arg1[%c0_10, %c0_11, %c0_12] : memref<1x8x256xf32, #tpu.memory_space<vmem>>, vector<1x8x256xf32>
    %7 = vector.shape_cast %6 : vector<1x8x256xf32> to vector<8x256xf32>
    %c0_13 = arith.constant 0 : index
    %c0_14 = arith.constant 0 : index
    %8 = vector.load %arg2[%c0_13, %c0_14] : memref<256x9xf32, #tpu.memory_space<vmem>>, vector<256x9xf32>
    %cst = arith.constant dense<0.000000e+00> : vector<8x9xf32>
    %9 = tpu.matmul %7, %8, %cst {dimension_numbers = #tpu.dot_dimension_numbers<[1], [0], [0], [1], [0, 0, 1, 1], [], []>} : vector<8x256xf32>, vector<256x9xf32>, vector<8x9xf32> -> vector<8x9xf32>
    %cst_15 = arith.constant dense<0.000000e+00> : vector<2x9xf32>
    %10 = tpu.matmul %0, %9, %cst_15 {dimension_numbers = #tpu.dot_dimension_numbers<[1], [0], [0], [1], [0, 0, 1, 1], [], []>} : vector<2x8xf32>, vector<8x9xf32>, vector<2x9xf32> -> vector<2x9xf32>
    %11 = vector.broadcast %2 : vector<2x1xf32> to vector<2x9xf32>
    %12 = arith.addf %10, %11 : vector<2x9xf32>
    %cst_16 = arith.constant 0.000000e+00 : f32
    %13 = vector.broadcast %cst_16 : f32 to vector<2x9xf32>
    %14 = arith.cmpf oge, %12, %13 : vector<2x9xf32>
    %15 = vector.broadcast %3 : vector<2x1xf32> to vector<2x9xf32>
    %16 = arith.mulf %15, %12 : vector<2x9xf32>
    %17 = arith.select %14, %12, %16 : vector<2x9xi1>, vector<2x9xf32>
    %cst_17 = arith.constant dense<0.000000e+00> : vector<8x9xf32>
    %18 = tpu.matmul %1, %17, %cst_17 {dimension_numbers = #tpu.dot_dimension_numbers<[1], [0], [0], [1], [0, 0, 1, 1], [], []>} : vector<8x2xf32>, vector<2x9xf32>, vector<8x9xf32> -> vector<8x9xf32>
    %19 = vector.broadcast %4 : vector<8x1xf32> to vector<8x9xf32>
    %20 = arith.addf %18, %19 : vector<8x9xf32>
    %cst_18 = arith.constant 0.000000e+00 : f32
    %21 = vector.broadcast %cst_18 : f32 to vector<8x9xf32>
    %22 = arith.cmpf oge, %20, %21 : vector<8x9xf32>
    %23 = vector.broadcast %5 : vector<8x1xf32> to vector<8x9xf32>
    %24 = arith.mulf %23, %20 : vector<8x9xf32>
    %25 = arith.select %22, %20, %24 : vector<8x9xi1>, vector<8x9xf32>
    %cst_19 = arith.constant dense<0xFF800000> : vector<9xf32>
    %26 = vector.multi_reduction <maximumf>, %25, %cst_19 [0] : vector<8x9xf32> to vector<9xf32>
    %27 = vector.shape_cast %26 : vector<9xf32> to vector<1x9xf32>
    %28 = vector.broadcast %27 : vector<1x9xf32> to vector<8x9xf32>
    %29 = arith.subf %25, %28 : vector<8x9xf32>
    %30 = math.exp %29 : vector<8x9xf32>
    %cst_20 = arith.constant dense<0.000000e+00> : vector<9xf32>
    %31 = vector.multi_reduction <add>, %30, %cst_20 [0] : vector<8x9xf32> to vector<9xf32>
    %32 = vector.shape_cast %31 : vector<9xf32> to vector<1x9xf32>
    %33 = vector.broadcast %32 : vector<1x9xf32> to vector<8x9xf32>
    %34 = arith.divf %30, %33 : vector<8x9xf32>
    %c0_21 = arith.constant 0 : index
    %c0_22 = arith.constant 0 : index
    %35 = vector.load %arg3[%c0_21, %c0_22] : memref<9x256xf32, #tpu.memory_space<vmem>>, vector<9x256xf32>
    %cst_23 = arith.constant dense<0.000000e+00> : vector<8x256xf32>
    %36 = tpu.matmul %34, %35, %cst_23 {dimension_numbers = #tpu.dot_dimension_numbers<[1], [0], [0], [1], [0, 0, 1, 1], [], []>} : vector<8x9xf32>, vector<9x256xf32>, vector<8x256xf32> -> vector<8x256xf32>
    %37 = arith.mulf %7, %36 : vector<8x256xf32>
    %c0_24 = arith.constant 0 : index
    %c0_25 = arith.constant 0 : index
    %c0_26 = arith.constant 0 : index
    %38 = vector.load %arg8[%c0_24, %c0_25, %c0_26] : memref<1x8x256xf32, #tpu.memory_space<vmem>>, vector<1x8x256xf32>
    %39 = vector.shape_cast %38 : vector<1x8x256xf32> to vector<8x256xf32>
    %40 = vector.shape_cast %37 : vector<8x256xf32> to vector<1x8x256xf32>
    tpu.vector_store %arg8[%c0_24, %c0_25, %c0_26], %40 {strides = array<i32>} : memref<1x8x256xf32, #tpu.memory_space<vmem>>, vector<1x8x256xf32>,
    return
  }
  func.func @transform_0(%arg0: i32) -> (i32, i32, i32) {
    %c0_i32 = arith.constant 0 : i32
    %c0_i32_0 = arith.constant 0 : i32
    %c0_i32_1 = arith.constant 0 : i32
    return %arg0, %c0_i32, %c0_i32_0 : i32, i32, i32
  }
  func.func @transform_1(%arg0: i32) -> (i32, i32) {
    %c0_i32 = arith.constant 0 : i32
    %c0_i32_0 = arith.constant 0 : i32
    %c0_i32_1 = arith.constant 0 : i32
    return %c0_i32, %c0_i32_0 : i32, i32
  }
  func.func @transform_2(%arg0: i32) -> (i32, i32) {
    %c0_i32 = arith.constant 0 : i32
    %c0_i32_0 = arith.constant 0 : i32
    %c0_i32_1 = arith.constant 0 : i32
    return %c0_i32, %c0_i32_0 : i32, i32
  }
  func.func @transform_3(%arg0: i32) -> (i32, i32) {
    %c0_i32 = arith.constant 0 : i32
    %c0_i32_0 = arith.constant 0 : i32
    %c0_i32_1 = arith.constant 0 : i32
    return %c0_i32, %c0_i32_0 : i32, i32
  }
  func.func @transform_4(%arg0: i32) -> (i32, i32) {
    %c0_i32 = arith.constant 0 : i32
    %c0_i32_0 = arith.constant 0 : i32
    %c0_i32_1 = arith.constant 0 : i32
    return %c0_i32, %c0_i32_0 : i32, i32
  }
  func.func @transform_5(%arg0: i32) -> (i32, i32) {
    %c0_i32 = arith.constant 0 : i32
    %c0_i32_0 = arith.constant 0 : i32
    %c0_i32_1 = arith.constant 0 : i32
    return %c0_i32, %c0_i32_0 : i32, i32
  }
  func.func @transform_6(%arg0: i32) -> (i32, i32) {
    %c0_i32 = arith.constant 0 : i32
    %c0_i32_0 = arith.constant 0 : i32
    %c0_i32_1 = arith.constant 0 : i32
    return %c0_i32, %c0_i32_0 : i32, i32
  }
  func.func @transform_7(%arg0: i32) -> (i32, i32, i32) {
    %c0_i32 = arith.constant 0 : i32
    %c0_i32_0 = arith.constant 0 : i32
    %c0_i32_1 = arith.constant 0 : i32
    return %arg0, %c0_i32, %c0_i32_0 : i32, i32, i32
  }
}

</mosaic_0001>

<bundles_post_ra>
// kernel: tpu_custom_call.1
= control target key start
LH: loop header
LB: loop body
LE: loop exit
PB: predicated region body
PF: predicated region fallthrough
CT: control target
= control target key end

     0   :  { %12 = vsyncpa [#allocation3], 0  ;;  %s1195_s0 = inlined_call_operand.vmem [shape: f32[2,8,256], index: 0, kind: input, shape index: {}]   ;;  %s1196_s1 = inlined_call_operand.vmem [shape: f32[256,9], index: 1, kind: input, shape index: {}]   ;;  %s1197_s2 = inlined_call_operand.vmem [shape: f32[9,256], index: 2, kind: input, shape index: {}]   ;;  %s1198_s3 = inlined_call_operand.vmem [shape: f32[2,8], index: 3, kind: input, shape index: {}]   ;;  %s1199_s4 = inlined_call_operand.vmem [shape: f32[2,2], index: 4, kind: input, shape index: {}]   ;;  %s1200_s5 = inlined_call_operand.vmem [shape: f32[8,2], index: 5, kind: input, shape index: {}]   ;;  %s1201_s6 = inlined_call_operand.vmem [shape: f32[8,2], index: 6, kind: input, shape index: {}]   ;;  %s1202_s7 = inlined_call_operand.hbm [shape: f32[2,8,256], index: 7, kind: output, shape index: {}]  }
   0x1   :  { %14 = vsyncpa [#allocation3 + $0x1], 0  ;;  %s971_s24 = smov 0   ;;  %s973_s25 = smov 0  }
   0x2   :  { %s975_s26 = smov 0   ;;  %s977_s27 = smov 0  }
   0x3 LB: > { %s992_s28 = sadd.s32 4294967295, %s924_s27   ;;  %s744_s29 = sadd.s32 4294967294, %s924_s27   ;;  %s924_s27 = sphi %s977_s27, %s1208_s27   ;;  %s920_s26 = sphi %s975_s26, %s1207_s26   ;;  %s916_s25 = sphi %s973_s25, %s1206_s25   ;;  %s912_s24 = sphi %s971_s24, %s1205_s24  }
   0x4   : > { %s996_s30 = sadd.s32 1, %s924_s27   ;;  %s179_s8 = sadd.s32 1, %s920_s26 }
   0x5   : > { %s176_s9 = ssub.s32 %s924_s27, %s996_s30  ;;  %p189_p0 = scmp.ne.s32.totalorder %s920_s26, %s916_s25 }
   0x6   : > { %p177_p1 = scmp.eq.s32.totalorder %s176_s9, 0  ;;  %p190_p2 = scmp.eq.s32.totalorder %s992_s28, 1 }
   0x7   : > { %p195_p3 = scmp.ne.s32.totalorder %s916_s25, %s912_s24  ;;  %p196_p4 = scmp.eq.s32.totalorder %s744_s29, 1 }
   0x8   : > { %s1007_s10 = scalar_select %p177_p1, %s920_s26, %s179_s8  }
   0x9   : > { %p1009_p5 = por %p190_p2, %p189_p0  ;;  %p1013_p6 = por %p196_p4, %p195_p3 }
   0xa   : > { %p747_p7 = scmp.ge.s32.totalorder %s924_s27, 1  ;;  %p240_p8 = scmp.lt.s32.totalorder %s924_s27, 3 }
   0xc   : > { %p241_p9 = pnand %p747_p7, %p240_p8 }
   0xd   : > { %p272_p10 = scmp.lt.s32.totalorder (!%p241_p9), %s992_s28, 1  ;;  %s763_s18 = sshll.u32 (!%p241_p9), %s992_s28, 8 }
   0xe   : > { %244 = sbr.rel (%p241_p9) target bundleno = 917 (0x395), region = 48 }
  0x13   : > { %v314_v0 = vld [vmem:[%s1196_s1 + $0xf8] sm:$0xff]  ;;  %v313_v2 = vld [vmem:[%s1196_s1 + $0xf0] sm:$0xff]  ;;  %v312_v4 = vld [vmem:[%s1196_s1 + $0xe8] sm:$0xff]  ;;  %s273_s23 = scalar_select %p272_p10, %s992_s28, 1  ;;  %v926_v34 = vmov 0.0   ;;  %vm927_vm0 = vmmov 0  }
  0x14   : > { %v298_v1 = vld [vmem:[%s1196_s1 + $0x78] sm:$0xff]  ;;  %764 = vmatprep.subr.mxu0 %v314_v0  ;;  %v297_v3 = vld [vmem:[%s1196_s1 + $0x70] sm:$0xff]  ;;  %v296_v5 = vld [vmem:[%s1196_s1 + $0x68] sm:$0xff]  ;;  %803 = vmatprep.subr.mxu1 %v926_v34  ;;  %v928_v36 = vmov 0   ;;  %v929_v37 = vmov 1   ;;  %vm390_vm1 = vcmask 64512  }
  0x15   : > { %765 = vmatpush3.msra.mxu0 %v298_v1  ;;  %v311_v6 = vld [vmem:[%s1196_s1 + $0xe0] sm:$0xff]  ;;  %s762_s14 = sshll.u32 %s273_s23, 4  ;;  %v310_v8 = vld [vmem:[%s1196_s1 + $0xd8] sm:$0xff]  ;;  %v309_v10 = vld [vmem:[%s1196_s1 + $0xd0] sm:$0xff]  ;;  %805 = vmatprep.mubr.msk.f32.mxu1 %vm927_vm0, %v926_v34  ;;  %vm480_vm3 = vcmask 1041408   ;;  %vm476_vm4 = vcmask 15360   ;;  %s683_s23 = scalar_lea.hbm %s1202_s7, %s763_s18 }
  0x16   : > { %766 = vmatprep.subr.mxu0 %v313_v2  ;;  %v295_v7 = vld [vmem:[%s1196_s1 + $0x60] sm:$0xff]  ;;  %v294_v9 = vld [vmem:[%s1196_s1 + $0x58] sm:$0xff]  ;;  %s1054_s29 = scalar_lea.vmem %s1195_s0, %s762_s14  ;;  %v293_v11 = vld [vmem:[%s1196_s1 + $0x50] sm:$0xff]  ;;  %856 = vset.pattern.permute.xlu0 %v928_v36  ;;  %vm588_vm5 = vcmask 1040384   ;;  %vm561_vm7 = vcmask 72704   ;;  %s930_s28 = smov [#allocation2]  }
  0x17   : > { %767 = vmatpush3.msra.mxu0 %v297_v3  ;;  %v308_v12 = vld [vmem:[%s1196_s1 + $0xc8] sm:$0xff]  ;;  %v307_v15 = vld [vmem:[%s1196_s1 + $0xc0] sm:$0xff]  ;;  %v306_v17 = vld [vmem:[%s1196_s1 + $0xb8] sm:$0xff]  ;;  %858 = vset.pattern.permute.xlu1 %v928_v36  ;;  %s868_s13 = sshll.u32 %s930_s28, 4  ;;  %s869_s13 = int_to_ptr.vmem [resolvable:$false] %s868_s13 }
  0x18   : > { %768 = vmatprep.subr.mxu0 %v312_v4  ;;  %v1066_v13 = vld [vmem:[%s1054_s29 + $0x8] sm:$0xff]  ;;  %v291_v16 = vld [vmem:[%s1196_s1 + $0x40] sm:$0xff]  ;;  %v290_v18 = vld [vmem:[%s1196_s1 + $0x38] sm:$0xff]  ;;  %s870_s15 = scalar_lea.vmem %s869_s13, 512 }
  0x19   : > { %769 = vmatpush3.msra.mxu0 %v296_v5  ;;  %v292_v14 = vld [vmem:[%s1196_s1 + $0x48] sm:$0xff]  ;;  %379 = vmatprep.mubr.f32.mxu0 %v1066_v13  ;;  %v305_v19 = vld [vmem:[%s1196_s1 + $0xb0] sm:$0xff]  ;;  %v303_v23 = vld [vmem:[%s1196_s1 + $0xa0] sm:$0xff] }
  0x1a   : > { %770 = vmatprep.subr.mxu0 %v311_v6  ;;  %v289_v20 = vld [vmem:[%s1196_s1 + $0x30] sm:$0xff]  ;;  %v304_v21 = vld [vmem:[%s1196_s1 + $0xa8] sm:$0xff]  ;;  %v287_v24 = vld [vmem:[%s1196_s1 + $0x20] sm:$0xff] }
  0x1b   : > { %771 = vmatpush3.msra.mxu0 %v295_v7  ;;  %v288_v22 = vld [vmem:[%s1196_s1 + $0x28] sm:$0xff]  ;;  %v302_v25 = vld [vmem:[%s1196_s1 + $0x98] sm:$0xff]  ;;  %v301_v27 = vld [vmem:[%s1196_s1 + $0x90] sm:$0xff] }
  0x1c   : > { %772 = vmatprep.subr.mxu0 %v310_v8  ;;  %v286_v26 = vld [vmem:[%s1196_s1 + $0x18] sm:$0xff]  ;;  %v285_v28 = vld [vmem:[%s1196_s1 + $0x10] sm:$0xff]  ;;  %v300_v29 = vld [vmem:[%s1196_s1 + $0x88] sm:$0xff] }
  0x1d   : > { %773 = vmatpush3.msra.mxu0 %v294_v9  ;;  %v284_v30 = vld [vmem:[%s1196_s1 + $0x8] sm:$0xff]  ;;  %v299_v31 = vld [vmem:[%s1196_s1 + $0x80] sm:$0xff]  ;;  %v584_v51 = vld [vmem:[%s1197_s2 + $0x18] sm:$0x1] }
  0x1e   : > { %774 = vmatprep.subr.mxu0 %v309_v10  ;;  %v283_v32 = vld [vmem:[%s1196_s1] sm:$0xff]  ;;  %v583_v52 = vld [vmem:[%s1197_s2 + $0x10] sm:$0x1]  ;;  %v582_v53 = vld [vmem:[%s1197_s2 + $0x8] sm:$0xff] }
  0x1f   : > { %775 = vmatpush3.msra.mxu0 %v293_v11  ;;  %v1127_v33 = vld [vmem:[%s1054_s29] sm:$0xff]  ;;  %s269_s29 = sand.u32 1, %s916_s25  }
  0x20   : > { %776 = vmatprep.subr.mxu0 %v308_v12  ;;  %v279_v35 = vld [vmem:[%s1199_s4] sm:$0x3]  ;;  %s748_s17 = sshll.u32 %s269_s29, 4  ;;  %s671_s8 = scalar_lea.sflag [#allocation3], %s269_s29 }
  0x21   : > { %777 = vmatpush3.msra.mxu0 %v292_v14  ;;  %387 = vperm.xlu0 %856, %v279_v35   ;;  %v277_v41 = vld [vmem:[%s1198_s3] sm:$0x3]  ;;  %s271_s19 = scalar_lea.vmem [#allocation2], %s748_s17 }
  0x22   : > { %778 = vmatprep.subr.mxu0 %v307_v15  ;;  %v280_v42 = vld [vmem:[%s1201_s6] sm:$0xff]  ;;  %s685_s20 = sshll.u32 %s271_s19, 4  ;;  %s686_s20 = int_to_ptr.vmem [resolvable:$true] %s685_s20 }
  0x23   : > { %779 = vmatpush3.msra.mxu0 %v291_v16  ;;  %473 = vperm.xlu1 %858, %v280_v42   ;;  %v278_v49 = vld [vmem:[%s1200_s5] sm:$0xff]  ;;  %s864_s9 = scalar_lea.vmem %s686_s20, 256  ;;  %p871_p0 = scmp.lt.s32.totalorder %s686_s20, %s869_s13 }
  0x24   : > { %780 = vmatprep.subr.mxu0 %v306_v17  ;;  %v581_v54 = vld [vmem:[%s1197_s2] sm:$0xff]  ;;  %p865_p11 = scmp.ne.s32.totalorder %s686_s20, %s864_s9  ;;  %p872_p1 = scmp.lt.s32.totalorder %s870_s15, %s864_s9 }
  0x25   : > { %781 = vmatpush3.msra.mxu0 %v290_v18  ;;  %857 = vset.pattern.permute.xlu0 %v929_v37 }
  0x26   : > { %782 = vmatprep.subr.mxu0 %v305_v19  ;;  %466 = vperm.xlu0 %857, %v279_v35   ;;  %p866_p12 = pnand %p865_p11, %p1009_p5  ;;  %p873_p2 = por %p872_p1, %p871_p0 }
  0x27   : > { %783 = vmatpush3.msra.mxu0 %v289_v20  ;;  %859 = vset.pattern.permute.xlu1 %v929_v37 }
  0x28   : > { %784 = vmatprep.subr.mxu0 %v304_v21  ;;  %556 = vperm.xlu1 %859, %v280_v42   ;;  %p867_p13 = pneg %p866_p12 }
  0x29   : > { %785 = vmatpush3.msra.mxu0 %v288_v22 }
  0x2a   : > { %786 = vmatprep.subr.mxu0 %v303_v23  ;;  %p874_p3 = pnand %p873_p2, %p867_p13 }
  0x2b   : > { %787 = vmatpush3.msra.mxu0 %v287_v24 }
  0x2c   : > { %788 = vmatprep.subr.mxu0 %v302_v25 }
  0x2d   : > { %789 = vmatpush3.msra.mxu0 %v286_v26 }
  0x2e   : > { %790 = vmatprep.subr.mxu0 %v301_v27 }
  0x2f   : > { %791 = vmatpush3.msra.mxu0 %v285_v28 }
  0x30   : > { %792 = vmatprep.subr.mxu0 %v300_v29 }
  0x31   : > { %793 = vmatpush3.msra.mxu0 %v284_v30 }
  0x32   : > { %794 = vmatprep.subr.mxu0 %v299_v31 }
  0x33   : > { %795 = vmatpush3.msra.mxu0 %v283_v32 }
  0x34   : > { %380 = vmatmul.mubr.f32.vlgmr.msra.gmra.mxu0 %v1127_v33 }
  0x9c   : > { %v388_v43 = vpop.permute.xlu0 %387 }
  0x9e   : > { %v474_v55 = vpop.permute.xlu1 %473 }
  0xa1   : > { %v467_v45 = vpop.permute.xlu0 %466 }
  0xa3   : > { %v557_v57 = vpop.permute.xlu1 %556 }
  0xf4   : > { %v796_v38 = vpop.f32.mrf.mxu0 }
  0xf6   : > { %v797_v39 = vpop.f32.mrf.mxu0 }
  0xf7   : > { %v798_v40 = vadd.f32 %v797_v39, %v796_v38 }
  0xf9   : > { %804 = vmatpush3.msra.mxu1 %v798_v40 }
  0xfa   : > { %806 = vmatmul.mubr.msk.f32.vlgmr.msra.gmra.mxu1 %vm390_vm1, %v277_v41  ;;  %808 = vmatprep.subr.mxu1 %v926_v34 }
  0xfb   : > { %810 = vmatprep.mubr.msk.f32.mxu1 %vm927_vm0, %v926_v34 }
 0x1ba   : > { %v460_v44 = vpop.f32.mrf.mxu1 }
 0x1bb   : > { %v461_v46 = vadd.f32 %v460_v44, %v388_v43 }
 0x1bc   : > { %v807_v47 = vpop.f32.mrf.mxu1 }
 0x1bd   : > { %vm464_vm2 = vcmp.ge.f32.partialorder %v461_v46, 0.0  ;;  %v469_v48 = vmul.f32 %v467_v45, %v461_v46 }
 0x1bf   : > { %v470_v50 = vsel %vm464_vm2, %v461_v46, %v469_v48 }
 0x1c0   : > { %809 = vmatpush3.msk.msra.mxu1 %vm480_vm3, %v470_v50 }
 0x1c1   : > { %811 = vmatmul.mubr.msk.f32.vlgmr.msra.gmra.mxu1 %vm476_vm4, %v278_v49  ;;  %754 = vmatprep.subr.msk.mxu1 %vm588_vm5, %v584_v51 }
 0x1c2   : > { %659 = vmatprep.mubr.f32.mxu1 %v926_v34  ;;  %755 = vmatpush1.msk.msra.mxu1 %vm588_vm5, %v583_v52 }
 0x1c3   : > { %625 = vmatprep.subr.mxu1 %v582_v53 }
 0x1c4   : > { %626 = vmatpush1.msra.mxu1 %v581_v54 }
 0x281   : > { %v550_v56 = vpop.f32.mrf.mxu1 }
 0x282   : > { %v551_v58 = vadd.f32 %v550_v56, %v474_v55 }
 0x283   : > { %v812_v59 = vpop.f32.mrf.mxu1 }
 0x284   : > { %vm554_vm6 = vcmp.ge.f32.partialorder %v551_v58, 0.0  ;;  %v559_v60 = vmul.f32 %v557_v57, %v551_v58 }
 0x286   : > { %v560_v61 = vsel %vm554_vm6, %v551_v58, %v559_v60 }
 0x287   : > { %v562_v62 = vsel %vm561_vm7, %v560_v61, -inf }
 0x288   : > { %v563_v63 = vrot.slane %v562_v62, 4 }
 0x28a   : > { %v564_v0 = vmax.f32 %v562_v62, %v563_v63 }
 0x28c   : > { %v565_v1 = vrot.slane %v564_v0, 2 }
 0x28e   : > { %v566_v2 = vmax.f32 %v564_v0, %v565_v1 }
 0x290   : > { %v567_v3 = vrot.slane %v566_v2, 1 }
 0x292   : > { %v568_v4 = vmax.f32 %v566_v2, %v567_v3 }
 0x294   : > { %v569_v5 = vsub.f32 %v560_v61, %v568_v4 }
 0x296   : > { %v570_v6 = vmul.f32 1.442695, %v569_v5 }
 0x298   : > { %860 = vpow2.f32 %v570_v6 }
 0x2a5   : > { %v861_v7 = vpop.eup %860 }
 0x2a6   : > { %v572_v8 = vsel %vm561_vm7, %v861_v7, 0.0 }
 0x2a7   : > { %v573_v9 = vrot.slane %v572_v8, 4 }
 0x2a9   : > { %v574_v10 = vadd.f32 %v573_v9, %v572_v8 }
 0x2ab   : > { %v575_v11 = vrot.slane %v574_v10, 2 }
 0x2ad   : > { %v576_v12 = vadd.f32 %v575_v11, %v574_v10 }
 0x2af   : > { %v577_v14 = vrot.slane %v576_v12, 1 }
 0x2b1   : > { %v578_v15 = vadd.f32 %v577_v14, %v576_v12 }
 0x2b3   : > { %862 = vrcp.f32 %v578_v15 }
 0x2c0   : > { %v863_v16 = vpop.eup %862 }
 0x2c1   : > { %v580_v17 = vmul.f32 %v863_v16, %v861_v7 }
 0x2c3   : > { %756 = vmatmul.mubr.msk.f32.vlgmr.msra.gmra.mxu1 %vm561_vm7, %v580_v17 }
 0x383   : > { %v661_v18 = vpop.f32.mrf.mxu1 }
 0x384   : > { %v666_v19 = vmul.f32 %v661_v18, %v1127_v33 }
 0x385   : > { %v663_v20 = vpop.f32.mrf.mxu1 }
 0x386   : > { %668 = vst [vmem:[%s271_s19] sm:$0xff] %v666_v19  ;;  %v667_v21 = vmul.f32 %v663_v20, %v1066_v13 }
 0x388   : > { %669 = vst [vmem:[%s271_s19 + $0x8] sm:$0xff] %v667_v21 }
 0x389   : > { %877 = shalt.err (!%p874_p3)
}
 0x38a   : > { %s878_s16 = scalar_lea.hbm %s683_s23, 256  ;;  %s882_s17 = scalar_lea.hbm %s1202_s7, 512 }
 0x38b   : > { %p879_p4 = scmp.ne.s32.totalorder %s683_s23, %s878_s16  ;;  %p883_p9 = scmp.lt.s32.totalorder %s683_s23, %s1202_s7 }
 0x38c   : > { %p884_p10 = scmp.lt.s32.totalorder %s882_s17, %s878_s16 }
 0x38d   : > { %p880_p7 = pnand %p879_p4, %p1009_p5 }
 0x38e   : > { %p885_p11 = por %p884_p10, %p883_p9 }
 0x38f   : > { %p881_p8 = pneg %p880_p7 }
 0x391   : > { %p886_p12 = pnand %p885_p11, %p881_p8 }
 0x393   : > { %889 = shalt.err (!%p886_p12)
}
 0x394   : > { %813 = dma.vmem_to_hbm [thread:$0]  (%p1009_p5), %s686_s20, 256, %s683_s23, %s671_s8  }
 0x395 PF: > { %p819_p13 = scmp.ge.s32.totalorder %s924_s27, 2  ;;  %s697_s21 = sand.u32 1, %s912_s24  }
 0x396   : > { %s698_s22 = scalar_lea.sflag [#allocation3], %s697_s21 }
 0x397   : > { %p816_p0 = pnand %p819_p13, %p1013_p6 }
 0x399   : > { %p817_p1 = pneg %p816_p0 }
 0x39b   : > { %907 = dma.done.wait (%p817_p1), %s698_s22, 256  }
 0x39c   : > { %909 = vsyncadd (%p817_p1), %s698_s22, 4294967040  ;;  %p17_p2 = scmp.ge.s32.totalorder %s996_s30, 4   ;;  %s1205_s24 = smov %s916_s25 }
 0x39d   : > { %s1206_s25 = smov %s920_s26  ;;  %s1207_s26 = smov %s1007_s10 }
 0x39e   : > { %s1208_s27 = smov %s996_s30  ;;  %19 = sbr.rel (!%p17_p2) target bundleno = 3 (0x3), region = 83 }
 0x3a3   :  { %703 = vsyncpa [#allocation3], 1 }
 0x3a4   :  { %705 = vsyncpa [#allocation3 + $0x1], 1 }

// kernel: tpu_custom_call.1
= control target key start
LH: loop header
LB: loop body
LE: loop exit
PB: predicated region body
PF: predicated region fallthrough
CT: control target
= control target key end

     0   :  { %12 = vsyncpa [#allocation3], 0  ;;  %s1195_s0 = inlined_call_operand.vmem [shape: f32[2,8,256], index: 0, kind: input, shape index: {}]   ;;  %s1196_s1 = inlined_call_operand.vmem [shape: f32[256,9], index: 1, kind: input, shape index: {}]   ;;  %s1197_s2 = inlined_call_operand.vmem [shape: f32[9,256], index: 2, kind: input, shape index: {}]   ;;  %s1198_s3 = inlined_call_operand.vmem [shape: f32[2,8], index: 3, kind: input, shape index: {}]   ;;  %s1199_s4 = inlined_call_operand.vmem [shape: f32[2,2], index: 4, kind: input, shape index: {}]   ;;  %s1200_s5 = inlined_call_operand.vmem [shape: f32[8,2], index: 5, kind: input, shape index: {}]   ;;  %s1201_s6 = inlined_call_operand.vmem [shape: f32[8,2], index: 6, kind: input, shape index: {}]   ;;  %s1202_s7 = inlined_call_operand.hbm [shape: f32[2,8,256], index: 7, kind: output, shape index: {}]  }
   0x1   :  { %14 = vsyncpa [#allocation3 + $0x1], 0  ;;  %s971_s24 = smov 0   ;;  %s973_s25 = smov 0  }
   0x2   :  { %s975_s26 = smov 0   ;;  %s977_s27 = smov 0  }
   0x3 LB: > { %s992_s28 = sadd.s32 4294967295, %s924_s27   ;;  %s744_s29 = sadd.s32 4294967294, %s924_s27   ;;  %s924_s27 = sphi %s977_s27, %s1208_s27   ;;  %s920_s26 = sphi %s975_s26, %s1207_s26   ;;  %s916_s25 = sphi %s973_s25, %s1206_s25   ;;  %s912_s24 = sphi %s971_s24, %s1205_s24  }
   0x4   : > { %s996_s30 = sadd.s32 1, %s924_s27   ;;  %s179_s8 = sadd.s32 1, %s920_s26 }
   0x5   : > { %s176_s9 = ssub.s32 %s924_s27, %s996_s30  ;;  %p189_p0 = scmp.ne.s32.totalorder %s920_s26, %s916_s25 }
   0x6   : > { %p177_p1 = scmp.eq.s32.totalorder %s176_s9, 0  ;;  %p190_p2 = scmp.eq.s32.totalorder %s992_s28, 1 }
   0x7   : > { %p195_p3 = scmp.ne.s32.totalorder %s916_s25, %s912_s24  ;;  %p196_p4 = scmp.eq.s32.totalorder %s744_s29, 1 }
   0x8   : > { %s1007_s10 = scalar_select %p177_p1, %s920_s26, %s179_s8  }
   0x9   : > { %p1009_p5 = por %p190_p2, %p189_p0  ;;  %p1013_p6 = por %p196_p4, %p195_p3 }
   0xa   : > { %p747_p7 = scmp.ge.s32.totalorder %s924_s27, 1  ;;  %p240_p8 = scmp.lt.s32.totalorder %s924_s27, 3 }
   0xc   : > { %p241_p9 = pnand %p747_p7, %p240_p8 }
   0xd   : > { %p272_p10 = scmp.lt.s32.totalorder (!%p241_p9), %s992_s28, 1  ;;  %s763_s18 = sshll.u32 (!%p241_p9), %s992_s28, 8 }
   0xe   : > { %244 = sbr.rel (%p241_p9) target bundleno = 917 (0x395), region = 48 }
  0x13   : > { %v314_v0 = vld [vmem:[%s1196_s1 + $0xf8] sm:$0xff]  ;;  %v313_v2 = vld [vmem:[%s1196_s1 + $0xf0] sm:$0xff]  ;;  %v312_v4 = vld [vmem:[%s1196_s1 + $0xe8] sm:$0xff]  ;;  %s273_s23 = scalar_select %p272_p10, %s992_s28, 1  ;;  %v926_v34 = vmov 0.0   ;;  %vm927_vm0 = vmmov 0  }
  0x14   : > { %v298_v1 = vld [vmem:[%s1196_s1 + $0x78] sm:$0xff]  ;;  %764 = vmatprep.subr.mxu0 %v314_v0  ;;  %v297_v3 = vld [vmem:[%s1196_s1 + $0x70] sm:$0xff]  ;;  %v296_v5 = vld [vmem:[%s1196_s1 + $0x68] sm:$0xff]  ;;  %803 = vmatprep.subr.mxu1 %v926_v34  ;;  %v928_v36 = vmov 0   ;;  %v929_v37 = vmov 1   ;;  %vm390_vm1 = vcmask 64512  }
  0x15   : > { %765 = vmatpush3.msra.mxu0 %v298_v1  ;;  %v311_v6 = vld [vmem:[%s1196_s1 + $0xe0] sm:$0xff]  ;;  %s762_s14 = sshll.u32 %s273_s23, 4  ;;  %v310_v8 = vld [vmem:[%s1196_s1 + $0xd8] sm:$0xff]  ;;  %v309_v10 = vld [vmem:[%s1196_s1 + $0xd0] sm:$0xff]  ;;  %805 = vmatprep.mubr.msk.f32.mxu1 %vm927_vm0, %v926_v34  ;;  %vm480_vm3 = vcmask 1041408   ;;  %vm476_vm4 = vcmask 15360   ;;  %s683_s23 = scalar_lea.hbm %s1202_s7, %s763_s18 }
  0x16   : > { %766 = vmatprep.subr.mxu0 %v313_v2  ;;  %v295_v7 = vld [vmem:[%s1196_s1 + $0x60] sm:$0xff]  ;;  %v294_v9 = vld [vmem:[%s1196_s1 + $0x58] sm:$0xff]  ;;  %s1054_s29 = scalar_lea.vmem %s1195_s0, %s762_s14  ;;  %v293_v11 = vld [vmem:[%s1196_s1 + $0x50] sm:$0xff]  ;;  %856 = vset.pattern.permute.xlu0 %v928_v36  ;;  %vm588_vm5 = vcmask 1040384   ;;  %vm561_vm7 = vcmask 72704   ;;  %s930_s28 = smov [#allocation2]  }
  0x17   : > { %767 = vmatpush3.msra.mxu0 %v297_v3  ;;  %v308_v12 = vld [vmem:[%s1196_s1 + $0xc8] sm:$0xff]  ;;  %v307_v15 = vld [vmem:[%s1196_s1 + $0xc0] sm:$0xff]  ;;  %v306_v17 = vld [vmem:[%s1196_s1 + $0xb8] sm:$0xff]  ;;  %858 = vset.pattern.permute.xlu1 %v928_v36  ;;  %s868_s13 = sshll.u32 %s930_s28, 4  ;;  %s869_s13 = int_to_ptr.vmem [resolvable:$false] %s868_s13 }
  0x18   : > { %768 = vmatprep.subr.mxu0 %v312_v4  ;;  %v1066_v13 = vld [vmem:[%s1054_s29 + $0x8] sm:$0xff]  ;;  %v291_v16 = vld [vmem:[%s1196_s1 + $0x40] sm:$0xff]  ;;  %v290_v18 = vld [vmem:[%s1196_s1 + $0x38] sm:$0xff]  ;;  %s870_s15 = scalar_lea.vmem %s869_s13, 512 }
  0x19   : > { %769 = vmatpush3.msra.mxu0 %v296_v5  ;;  %v292_v14 = vld [vmem:[%s1196_s1 + $0x48] sm:$0xff]  ;;  %379 = vmatprep.mubr.f32.mxu0 %v1066_v13  ;;  %v305_v19 = vld [vmem:[%s1196_s1 + $0xb0] sm:$0xff]  ;;  %v303_v23 = vld [vmem:[%s1196_s1 + $0xa0] sm:$0xff] }
  0x1a   : > { %770 = vmatprep.subr.mxu0 %v311_v6  ;;  %v289_v20 = vld [vmem:[%s1196_s1 + $0x30] sm:$0xff]  ;;  %v304_v21 = vld [vmem:[%s1196_s1 + $0xa8] sm:$0xff]  ;;  %v287_v24 = vld [vmem:[%s1196_s1 + $0x20] sm:$0xff] }
  0x1b   : > { %771 = vmatpush3.msra.mxu0 %v295_v7  ;;  %v288_v22 = vld [vmem:[%s1196_s1 + $0x28] sm:$0xff]  ;;  %v302_v25 = vld [vmem:[%s1196_s1 + $0x98] sm:$0xff]  ;;  %v301_v27 = vld [vmem:[%s1196_s1 + $0x90] sm:$0xff] }
  0x1c   : > { %772 = vmatprep.subr.mxu0 %v310_v8  ;;  %v286_v26 = vld [vmem:[%s1196_s1 + $0x18] sm:$0xff]  ;;  %v285_v28 = vld [vmem:[%s1196_s1 + $0x10] sm:$0xff]  ;;  %v300_v29 = vld [vmem:[%s1196_s1 + $0x88] sm:$0xff] }
  0x1d   : > { %773 = vmatpush3.msra.mxu0 %v294_v9  ;;  %v284_v30 = vld [vmem:[%s1196_s1 + $0x8] sm:$0xff]  ;;  %v299_v31 = vld [vmem:[%s1196_s1 + $0x80] sm:$0xff]  ;;  %v584_v51 = vld [vmem:[%s1197_s2 + $0x18] sm:$0x1] }
  0x1e   : > { %774 = vmatprep.subr.mxu0 %v309_v10  ;;  %v283_v32 = vld [vmem:[%s1196_s1] sm:$0xff]  ;;  %v583_v52 = vld [vmem:[%s1197_s2 + $0x10] sm:$0x1]  ;;  %v582_v53 = vld [vmem:[%s1197_s2 + $0x8] sm:$0xff] }
  0x1f   : > { %775 = vmatpush3.msra.mxu0 %v293_v11  ;;  %v1127_v33 = vld [vmem:[%s1054_s29] sm:$0xff]  ;;  %s269_s29 = sand.u32 1, %s916_s25  }
  0x20   : > { %776 = vmatprep.subr.mxu0 %v308_v12  ;;  %v279_v35 = vld [vmem:[%s1199_s4] sm:$0x3]  ;;  %s748_s17 = sshll.u32 %s269_s29, 4  ;;  %s671_s8 = scalar_lea.sflag [#allocation3], %s269_s29 }
  0x21   : > { %777 = vmatpush3.msra.mxu0 %v292_v14  ;;  %387 = vperm.xlu0 %856, %v279_v35   ;;  %v277_v41 = vld [vmem:[%s1198_s3] sm:$0x3]  ;;  %s271_s19 = scalar_lea.vmem [#allocation2], %s748_s17 }
  0x22   : > { %778 = vmatprep.subr.mxu0 %v307_v15  ;;  %v280_v42 = vld [vmem:[%s1201_s6] sm:$0xff]  ;;  %s685_s20 = sshll.u32 %s271_s19, 4  ;;  %s686_s20 = int_to_ptr.vmem [resolvable:$true] %s685_s20 }
  0x23   : > { %779 = vmatpush3.msra.mxu0 %v291_v16  ;;  %473 = vperm.xlu1 %858, %v280_v42   ;;  %v278_v49 = vld [vmem:[%s1200_s5] sm:$0xff]  ;;  %s864_s9 = scalar_lea.vmem %s686_s20, 256  ;;  %p871_p0 = scmp.lt.s32.totalorder %s686_s20, %s869_s13 }
  0x24   : > { %780 = vmatprep.subr.mxu0 %v306_v17  ;;  %v581_v54 = vld [vmem:[%s1197_s2] sm:$0xff]  ;;  %p865_p11 = scmp.ne.s32.totalorder %s686_s20, %s864_s9  ;;  %p872_p1 = scmp.lt.s32.totalorder %s870_s15, %s864_s9 }
  0x25   : > { %781 = vmatpush3.msra.mxu0 %v290_v18  ;;  %857 = vset.pattern.permute.xlu0 %v929_v37 }
  0x26   : > { %782 = vmatprep.subr.mxu0 %v305_v19  ;;  %466 = vperm.xlu0 %857, %v279_v35   ;;  %p866_p12 = pnand %p865_p11, %p1009_p5  ;;  %p873_p2 = por %p872_p1, %p871_p0 }
  0x27   : > { %783 = vmatpush3.msra.mxu0 %v289_v20  ;;  %859 = vset.pattern.permute.xlu1 %v929_v37 }
  0x28   : > { %784 = vmatprep.subr.mxu0 %v304_v21  ;;  %556 = vperm.xlu1 %859, %v280_v42   ;;  %p867_p13 = pneg %p866_p12 }
  0x29   : > { %785 = vmatpush3.msra.mxu0 %v288_v22 }
  0x2a   : > { %786 = vmatprep.subr.mxu0 %v303_v23  ;;  %p874_p3 = pnand %p873_p2, %p867_p13 }
  0x2b   : > { %787 = vmatpush3.msra.mxu0 %v287_v24 }
  0x2c   : > { %788 = vmatprep.subr.mxu0 %v302_v25 }
  0x2d   : > { %789 = vmatpush3.msra.mxu0 %v286_v26 }
  0x2e   : > { %790 = vmatprep.subr.mxu0 %v301_v27 }
  0x2f   : > { %791 = vmatpush3.msra.mxu0 %v285_v28 }
  0x30   : > { %792 = vmatprep.subr.mxu0 %v300_v29 }
  0x31   : > { %793 = vmatpush3.msra.mxu0 %v284_v30 }
  0x32   : > { %794 = vmatprep.subr.mxu0 %v299_v31 }
  0x33   : > { %795 = vmatpush3.msra.mxu0 %v283_v32 }
  0x34   : > { %380 = vmatmul.mubr.f32.vlgmr.msra.gmra.mxu0 %v1127_v33 }
  0x9c   : > { %v388_v43 = vpop.permute.xlu0 %387 }
  0x9e   : > { %v474_v55 = vpop.permute.xlu1 %473 }
  0xa1   : > { %v467_v45 = vpop.permute.xlu0 %466 }
  0xa3   : > { %v557_v57 = vpop.permute.xlu1 %556 }
  0xf4   : > { %v796_v38 = vpop.f32.mrf.mxu0 }
  0xf6   : > { %v797_v39 = vpop.f32.mrf.mxu0 }
  0xf7   : > { %v798_v40 = vadd.f32 %v797_v39, %v796_v38 }
  0xf9   : > { %804 = vmatpush3.msra.mxu1 %v798_v40 }
  0xfa   : > { %806 = vmatmul.mubr.msk.f32.vlgmr.msra.gmra.mxu1 %vm390_vm1, %v277_v41  ;;  %808 = vmatprep.subr.mxu1 %v926_v34 }
  0xfb   : > { %810 = vmatprep.mubr.msk.f32.mxu1 %vm927_vm0, %v926_v34 }
 0x1ba   : > { %v460_v44 = vpop.f32.mrf.mxu1 }
 0x1bb   : > { %v461_v46 = vadd.f32 %v460_v44, %v388_v43 }
 0x1bc   : > { %v807_v47 = vpop.f32.mrf.mxu1 }
 0x1bd   : > { %vm464_vm2 = vcmp.ge.f32.partialorder %v461_v46, 0.0  ;;  %v469_v48 = vmul.f32 %v467_v45, %v461_v46 }
 0x1bf   : > { %v470_v50 = vsel %vm464_vm2, %v461_v46, %v469_v48 }
 0x1c0   : > { %809 = vmatpush3.msk.msra.mxu1 %vm480_vm3, %v470_v50 }
 0x1c1   : > { %811 = vmatmul.mubr.msk.f32.vlgmr.msra.gmra.mxu1 %vm476_vm4, %v278_v49  ;;  %754 = vmatprep.subr.msk.mxu1 %vm588_vm5, %v584_v51 }
 0x1c2   : > { %659 = vmatprep.mubr.f32.mxu1 %v926_v34  ;;  %755 = vmatpush1.msk.msra.mxu1 %vm588_vm5, %v583_v52 }
 0x1c3   : > { %625 = vmatprep.subr.mxu1 %v582_v53 }
 0x1c4   : > { %626 = vmatpush1.msra.mxu1 %v581_v54 }
 0x281   : > { %v550_v56 = vpop.f32.mrf.mxu1 }
 0x282   : > { %v551_v58 = vadd.f32 %v550_v56, %v474_v55 }
 0x283   : > { %v812_v59 = vpop.f32.mrf.mxu1 }
 0x284   : > { %vm554_vm6 = vcmp.ge.f32.partialorder %v551_v58, 0.0  ;;  %v559_v60 = vmul.f32 %v557_v57, %v551_v58 }
 0x286   : > { %v560_v61 = vsel %vm554_vm6, %v551_v58, %v559_v60 }
 0x287   : > { %v562_v62 = vsel %vm561_vm7, %v560_v61, -inf }
 0x288   : > { %v563_v63 = vrot.slane %v562_v62, 4 }
 0x28a   : > { %v564_v0 = vmax.f32 %v562_v62, %v563_v63 }
 0x28c   : > { %v565_v1 = vrot.slane %v564_v0, 2 }
 0x28e   : > { %v566_v2 = vmax.f32 %v564_v0, %v565_v1 }
 0x290   : > { %v567_v3 = vrot.slane %v566_v2, 1 }
 0x292   : > { %v568_v4 = vmax.f32 %v566_v2, %v567_v3 }
 0x294   : > { %v569_v5 = vsub.f32 %v560_v61, %v568_v4 }
 0x296   : > { %v570_v6 = vmul.f32 1.442695, %v569_v5 }
 0x298   : > { %860 = vpow2.f32 %v570_v6 }
 0x2a5   : > { %v861_v7 = vpop.eup %860 }
 0x2a6   : > { %v572_v8 = vsel %vm561_vm7, %v861_v7, 0.0 }
 0x2a7   : > { %v573_v9 = vrot.slane %v572_v8, 4 }
 0x2a9   : > { %v574_v10 = vadd.f32 %v573_v9, %v572_v8 }
 0x2ab   : > { %v575_v11 = vrot.slane %v574_v10, 2 }
 0x2ad   : > { %v576_v12 = vadd.f32 %v575_v11, %v574_v10 }
 0x2af   : > { %v577_v14 = vrot.slane %v576_v12, 1 }
 0x2b1   : > { %v578_v15 = vadd.f32 %v577_v14, %v576_v12 }
 0x2b3   : > { %862 = vrcp.f32 %v578_v15 }
 0x2c0   : > { %v863_v16 = vpop.eup %862 }
 0x2c1   : > { %v580_v17 = vmul.f32 %v863_v16, %v861_v7 }
 0x2c3   : > { %756 = vmatmul.mubr.msk.f32.vlgmr.msra.gmra.mxu1 %vm561_vm7, %v580_v17 }
 0x383   : > { %v661_v18 = vpop.f32.mrf.mxu1 }
 0x384   : > { %v666_v19 = vmul.f32 %v661_v18, %v1127_v33 }
 0x385   : > { %v663_v20 = vpop.f32.mrf.mxu1 }
 0x386   : > { %668 = vst [vmem:[%s271_s19] sm:$0xff] %v666_v19  ;;  %v667_v21 = vmul.f32 %v663_v20, %v1066_v13 }
 0x388   : > { %669 = vst [vmem:[%s271_s19 + $0x8] sm:$0xff] %v667_v21 }
 0x389   : > { %877 = shalt.err (!%p874_p3)
}
 0x38a   : > { %s878_s16 = scalar_lea.hbm %s683_s23, 256  ;;  %s882_s17 = scalar_lea.hbm %s1202_s7, 512 }
 0x38b   : > { %p879_p4 = scmp.ne.s32.totalorder %s683_s23, %s878_s16  ;;  %p883_p9 = scmp.lt.s32.totalorder %s683_s23, %s1202_s7 }
 0x38c   : > { %p884_p10 = scmp.lt.s32.totalorder %s882_s17, %s878_s16 }
 0x38d   : > { %p880_p7 = pnand %p879_p4, %p1009_p5 }
 0x38e   : > { %p885_p11 = por %p884_p10, %p883_p9 }
 0x38f   : > { %p881_p8 = pneg %p880_p7 }
 0x391   : > { %p886_p12 = pnand %p885_p11, %p881_p8 }
 0x393   : > { %889 = shalt.err (!%p886_p12)
}
 0x394   : > { %813 = dma.vmem_to_hbm [thread:$0]  (%p1009_p5), %s686_s20, 256, %s683_s23, %s671_s8  }
 0x395 PF: > { %p819_p13 = scmp.ge.s32.totalorder %s924_s27, 2  ;;  %s697_s21 = sand.u32 1, %s912_s24  }
 0x396   : > { %s698_s22 = scalar_lea.sflag [#allocation3], %s697_s21 }
 0x397   : > { %p816_p0 = pnand %p819_p13, %p1013_p6 }
 0x399   : > { %p817_p1 = pneg %p816_p0 }
 0x39b   : > { %907 = dma.done.wait (%p817_p1), %s698_s22, 256  }
 0x39c   : > { %909 = vsyncadd (%p817_p1), %s698_s22, 4294967040  ;;  %p17_p2 = scmp.ge.s32.totalorder %s996_s30, 4   ;;  %s1205_s24 = smov %s916_s25 }
 0x39d   : > { %s1206_s25 = smov %s920_s26  ;;  %s1207_s26 = smov %s1007_s10 }
 0x39e   : > { %s1208_s27 = smov %s996_s30  ;;  %19 = sbr.rel (!%p17_p2) target bundleno = 3 (0x3), region = 83 }
 0x3a3   :  { %703 = vsyncpa [#allocation3], 1 }
 0x3a4   :  { %705 = vsyncpa [#allocation3 + $0x1], 1 }

</bundles_post_ra>
